<compile_context>
chip_gen: v7x
topology: tpu7x:2x2x1
jax: 0.10.0
libtpu: 0.0.40
codegen_flags: <defaults>
</compile_context>

<pallas_src>
import jax
import jax.numpy as jnp
from jax.experimental import pallas as pl
from jax.experimental.pallas import tpu as pltpu

C_IN = 4                       # input_feature == 'ND'
C_POS = 3                      # octree.position (x, y, z)
C_FUSED = C_IN + C_POS         # fused kernel input rows (feat ++ position)
C_OUT = 7                      # model out_channels (no material, no gaussian_loss)
C_GAUSS = 3 + 1 + 3 + 4 + 3    # pos + opacity + scale + rotation + rgb = 14


def lgm_gaussian_kernel(inp_ref, w_ref, b_ref, gauss_ref):
    """One lane-tile of octree nodes (channel-major, lane-dense layout).

    inp_ref  : [7, TN]  VMEM  rows 0:4 = input feature (ND), rows 4:7 = position
    w_ref    : [7, 4]   VMEM  backbone stand-in weight, transposed (C_OUT, C_IN)
    b_ref    : [7, 1]   VMEM  backbone stand-in bias
    gauss_ref: [14, TN] VMEM  output gaussians, channel-major
    """
    inp = inp_ref[...]                      # [7, TN] f32 (single tile load)
    f = inp[0:C_IN, :]                      # [4, TN] features
    pos = inp[C_IN:C_FUSED, :]              # [3, TN] octree.position
    tn = inp.shape[1]

    w = w_ref[...]                          # [7, 4]
    b = b_ref[...]                          # [7, 1]

    # Backbone stand-in projection as one [7, TN] slab on the VPU:
    # x[c] = sum_k w[c,k] * f[k] + b[c]  (lane-broadcast of w column,
    # sublane-broadcast of the feature row; K=4 would waste the MXU).
    x = w[:, 0:1] * f[0:1, :]
    for k in range(1, C_IN):
        x = x + w[:, k:k + 1] * f[k:k + 1, :]
    x = x + b                               # [7, TN]

    # Gaussian head — batched multi-row stores (5 stores total).
    # pos_act: clamp(-1, 1)                              -> channels 0:3
    gauss_ref[0:3, :] = jnp.clip(pos, -1.0, 1.0)
    # opacity_act: sigmoid(x[0])                         -> channel 3
    gauss_ref[3:4, :] = jax.nn.sigmoid(x[0:1, :])
    # scale_act: 0.01 * softplus(x[1:4])                 -> channels 4:7
    gauss_ref[4:7, :] = 0.01 * jax.nn.softplus(x[1:4, :])
    # rot_act: F.normalize of the inserted zero channels is still zero ->
    # constant-zero slab (valid only because out_channels == 7).  7:11
    gauss_ref[7:11, :] = jnp.zeros((4, tn), jnp.float32)
    # rgb_act: sigmoid(x[4:7])                           -> channels 11:14
    gauss_ref[11:14, :] = jax.nn.sigmoid(x[4:7, :])
    # TODO(synk): on v7x, if the single EUP ever binds after the bandwidth
    # fixes, sigmoid can be expressed as exp + pl.reciprocal(approx=True).


def lgm_forward_gaussians(inputs_cn, w, b, *, tile_n=65536):
    """Pallas wrapper mirroring forward_gaussians() (channel-major interface).

    inputs_cn : [7, N] f32  rows 0:4 = input feature 'ND', rows 4:7 = position
    w         : [4, 7] f32  backbone stand-in weight (in_channels, out_channels)
    b         : [7]    f32  backbone stand-in bias
    Returns (gaussian_loss, gaussians_cn [14, N]); gaussians are channel-major
    (transpose of PyTorch's [N, 14]) so every store is lane-dense.

    tile_n sizing: 65536 nodes -> 1.75 MiB in + 3.5 MiB out per step,
    ~10.5 MiB double-buffered — fits the default scoped VMEM on v5e (16 MiB),
    v6e and v7x (32 MiB).  On v6e one may raise to ~128k; past ~96k on v5e set
    pltpu.CompilerParams(vmem_limit_bytes=...).  Keep >= 2 grid steps at large
    N so dimension_semantics=("parallel",) can shard across v7x's two TCs.
    """
    c, n = inputs_cn.shape
    assert c == C_FUSED
    # The rotation-is-zero shortcut in the kernel is only valid for the
    # out_channels == 7 head; guard it here.
    assert w.shape == (C_IN, C_OUT) and b.shape == (C_OUT,)
    assert tile_n % 128 == 0

    w_t = jnp.asarray(w.T, dtype=jnp.float32)            # [7, 4]
    b_c = jnp.asarray(b, dtype=jnp.float32).reshape(C_OUT, 1)

    if n <= tile_n:
        # Block == full array dims: always a legal TPU block shape.
        block_n = n
        grid = (1,)
    else:
        # block_n is a multiple of 128; Pallas masks the partial final block
        # (no jnp.pad of the inputs, no output slice afterwards).
        block_n = tile_n
        grid = (pl.cdiv(n, tile_n),)

    gaussians_cn = pl.pallas_call(
        lgm_gaussian_kernel,
        out_shape=jax.ShapeDtypeStruct((C_GAUSS, n), jnp.float32),
        grid=grid,
        in_specs=[
            pl.BlockSpec((C_FUSED, block_n), lambda i: (0, i)),
            pl.BlockSpec((C_OUT, C_IN), lambda i: (0, 0)),
            pl.BlockSpec((C_OUT, 1), lambda i: (0, 0)),
        ],
        out_specs=pl.BlockSpec((C_GAUSS, block_n), lambda i: (0, i)),
        compiler_params=pltpu.CompilerParams(
            dimension_semantics=("parallel",)),
    )(inputs_cn, w_t, b_c)

    # gaussian_loss = torch.zeros(1) when opt.gaussian_loss is False
    gaussian_loss = jnp.zeros((1,), jnp.float32)
    return gaussian_loss, gaussians_cn


def _reference(feat, position, w, b):
    """Pure-JAX reference mirroring the PyTorch code path (row-major [N, C])."""
    x = feat @ w + b
    zeros = jnp.zeros((x.shape[0], 4), jnp.float32)
    x = jnp.concatenate([x[:, :4], zeros, x[:, 4:]], axis=1)
    pos = jnp.clip(position, -1.0, 1.0)
    opacity = jax.nn.sigmoid(x[:, 0:1])
    scale = 0.01 * jax.nn.softplus(x[:, 1:4])
    rot = x[:, 4:8]
    rot = rot / jnp.maximum(
        jnp.sqrt(jnp.sum(rot * rot, axis=-1, keepdims=True)), 1e-12)
    rgbs = jax.nn.sigmoid(x[:, 8:11])
    return jnp.concatenate([pos, opacity, scale, rot, rgbs], axis=-1)


if __name__ == "__main__":
    key = jax.random.PRNGKey(0)
    k_feat, k_xyz, k_w, k_b = jax.random.split(key, 4)

    N = 1000           # non-empty octree leaf nodes (not a tile/128 multiple)
    depth = 6          # octree input_depth

    # Per-node input feature (normal + displacement, 'ND').
    feat_nc = jax.random.normal(k_feat, (N, C_IN), dtype=jnp.float32)

    # Integer voxel coordinates -> octree.position = 2*xyz/2^depth - 1 (glue).
    xyz = jax.random.randint(k_xyz, (N, 3), 0, 2 ** depth).astype(jnp.float32)
    position_nc = 2.0 * xyz / (2.0 ** depth) - 1.0

    # Deterministic backbone stand-in parameters.
    w = jax.random.normal(k_w, (C_IN, C_OUT), dtype=jnp.float32) * 0.1
    b = jax.random.normal(k_b, (C_OUT,), dtype=jnp.float32) * 0.1

    # Upstream glue: fused channel-major (lane-dense) input [7, N].
    inputs_cn = jnp.concatenate([feat_nc.T, position_nc.T], axis=0)
    inputs_cn = jnp.asarray(inputs_cn, dtype=jnp.float32)

    ref = _reference(feat_nc, position_nc, w, b)     # [N, 14]

    # 1) Default large tile: single block whose dims equal the full array.
    loss1, g1 = lgm_forward_gaussians(inputs_cn, w, b)
    jax.block_until_ready(g1)
    assert g1.shape == (C_GAUSS, N)
    assert jnp.allclose(g1.T, ref, atol=1e-5, rtol=1e-5)
    assert float(loss1[0]) == 0.0

    # 2) Multi-block grid (tile_n=512 -> 2 steps) exercising the masked
    #    partial final block, i.e. the no-pad/no-slice path at N % tile != 0.
    loss2, g2 = lgm_forward_gaussians(inputs_cn, w, b, tile_n=512)
    jax.block_until_ready(g2)
    assert g2.shape == (C_GAUSS, N)
    assert jnp.allclose(g2.T, ref, atol=1e-5, rtol=1e-5)
    assert float(loss2[0]) == 0.0

    print("KERNEL_OK")
</pallas_src>

<mosaic_0001>
module attributes {stable_mosaic.version = 11 : i64} {
  func.func @lgm_gaussian_kernel(%arg0: i32, %arg1: memref<7x1000xf32, #tpu.memory_space<vmem>>, %arg2: memref<7x4xf32, #tpu.memory_space<vmem>>, %arg3: memref<7x1xf32, #tpu.memory_space<vmem>>, %arg4: memref<14x1000xf32, #tpu.memory_space<vmem>>) attributes {dimension_semantics = [#tpu.dimension_semantics<parallel>], iteration_bounds = array<i64: 1>, scalar_prefetch = 0 : i64, scratch_operands = 0 : i64, tpu.core_type = #tpu.core_type<tc>, window_params = [{transform_indices = @transform_0, window_bounds = array<i64: 7, 1000>}, {pipeline_mode = #tpu.pipeline_mode<synchronous>, transform_indices = @transform_1, window_bounds = array<i64: 7, 4>}, {pipeline_mode = #tpu.pipeline_mode<synchronous>, transform_indices = @transform_2, window_bounds = array<i64: 7, 1>}, {transform_indices = @transform_3, window_bounds = array<i64: 14, 1000>}]} {
    %c0 = arith.constant 0 : index
    %c0_0 = arith.constant 0 : index
    %0 = vector.load %arg1[%c0, %c0_0] : memref<7x1000xf32, #tpu.memory_space<vmem>>, vector<7x1000xf32>
    %1 = vector.extract_strided_slice %0 {offsets = [0, 0], sizes = [4, 1000], strides = [1, 1]} : vector<7x1000xf32> to vector<4x1000xf32>
    %2 = vector.extract_strided_slice %0 {offsets = [4, 0], sizes = [3, 1000], strides = [1, 1]} : vector<7x1000xf32> to vector<3x1000xf32>
    %c0_1 = arith.constant 0 : index
    %c0_2 = arith.constant 0 : index
    %3 = vector.load %arg2[%c0_1, %c0_2] : memref<7x4xf32, #tpu.memory_space<vmem>>, vector<7x4xf32>
    %c0_3 = arith.constant 0 : index
    %c0_4 = arith.constant 0 : index
    %4 = vector.load %arg3[%c0_3, %c0_4] : memref<7x1xf32, #tpu.memory_space<vmem>>, vector<7x1xf32>
    %5 = vector.extract_strided_slice %3 {offsets = [0, 0], sizes = [7, 1], strides = [1, 1]} : vector<7x4xf32> to vector<7x1xf32>
    %6 = vector.extract_strided_slice %1 {offsets = [0, 0], sizes = [1, 1000], strides = [1, 1]} : vector<4x1000xf32> to vector<1x1000xf32>
    %7 = vector.broadcast %5 : vector<7x1xf32> to vector<7x1000xf32>
    %8 = vector.broadcast %6 : vector<1x1000xf32> to vector<7x1000xf32>
    %9 = arith.mulf %7, %8 : vector<7x1000xf32>
    %10 = vector.extract_strided_slice %3 {offsets = [0, 1], sizes = [7, 1], strides = [1, 1]} : vector<7x4xf32> to vector<7x1xf32>
    %11 = vector.extract_strided_slice %1 {offsets = [1, 0], sizes = [1, 1000], strides = [1, 1]} : vector<4x1000xf32> to vector<1x1000xf32>
    %12 = vector.broadcast %10 : vector<7x1xf32> to vector<7x1000xf32>
    %13 = vector.broadcast %11 : vector<1x1000xf32> to vector<7x1000xf32>
    %14 = arith.mulf %12, %13 : vector<7x1000xf32>
    %15 = arith.addf %9, %14 : vector<7x1000xf32>
    %16 = vector.extract_strided_slice %3 {offsets = [0, 2], sizes = [7, 1], strides = [1, 1]} : vector<7x4xf32> to vector<7x1xf32>
    %17 = vector.extract_strided_slice %1 {offsets = [2, 0], sizes = [1, 1000], strides = [1, 1]} : vector<4x1000xf32> to vector<1x1000xf32>
    %18 = vector.broadcast %16 : vector<7x1xf32> to vector<7x1000xf32>
    %19 = vector.broadcast %17 : vector<1x1000xf32> to vector<7x1000xf32>
    %20 = arith.mulf %18, %19 : vector<7x1000xf32>
    %21 = arith.addf %15, %20 : vector<7x1000xf32>
    %22 = vector.extract_strided_slice %3 {offsets = [0, 3], sizes = [7, 1], strides = [1, 1]} : vector<7x4xf32> to vector<7x1xf32>
    %23 = vector.extract_strided_slice %1 {offsets = [3, 0], sizes = [1, 1000], strides = [1, 1]} : vector<4x1000xf32> to vector<1x1000xf32>
    %24 = vector.broadcast %22 : vector<7x1xf32> to vector<7x1000xf32>
    %25 = vector.broadcast %23 : vector<1x1000xf32> to vector<7x1000xf32>
    %26 = arith.mulf %24, %25 : vector<7x1000xf32>
    %27 = arith.addf %21, %26 : vector<7x1000xf32>
    %28 = vector.broadcast %4 : vector<7x1xf32> to vector<7x1000xf32>
    %29 = arith.addf %27, %28 : vector<7x1000xf32>
    %cst = arith.constant -1.000000e+00 : f32
    %cst_5 = arith.constant 1.000000e+00 : f32
    %30 = vector.broadcast %cst : f32 to vector<3x1000xf32>
    %31 = arith.maximumf %30, %2 : vector<3x1000xf32>
    %32 = vector.broadcast %cst_5 : f32 to vector<3x1000xf32>
    %33 = arith.minimumf %32, %31 : vector<3x1000xf32>
    %c0_6 = arith.constant 0 : index
    %c0_7 = arith.constant 0 : index
    %34 = vector.load %arg4[%c0_6, %c0_7] : memref<14x1000xf32, #tpu.memory_space<vmem>>, vector<3x1000xf32>
    tpu.vector_store %arg4[%c0_6, %c0_7], %33 {strides = array<i32>} : memref<14x1000xf32, #tpu.memory_space<vmem>>, vector<3x1000xf32>,
    %35 = vector.extract_strided_slice %29 {offsets = [0, 0], sizes = [1, 1000], strides = [1, 1]} : vector<7x1000xf32> to vector<1x1000xf32>
    %36 = arith.negf %35 : vector<1x1000xf32>
    %37 = math.exp %36 : vector<1x1000xf32>
    %cst_8 = arith.constant 1.000000e+00 : f32
    %38 = vector.broadcast %cst_8 : f32 to vector<1x1000xf32>
    %39 = arith.addf %38, %37 : vector<1x1000xf32>
    %40 = arith.divf %38, %39 : vector<1x1000xf32>
    %c3 = arith.constant 3 : index
    %c0_9 = arith.constant 0 : index
    %41 = vector.load %arg4[%c3, %c0_9] : memref<14x1000xf32, #tpu.memory_space<vmem>>, vector<1x1000xf32>
    tpu.vector_store %arg4[%c3, %c0_9], %40 {strides = array<i32>} : memref<14x1000xf32, #tpu.memory_space<vmem>>, vector<1x1000xf32>,
    %42 = vector.extract_strided_slice %29 {offsets = [1, 0], sizes = [3, 1000], strides = [1, 1]} : vector<7x1000xf32> to vector<3x1000xf32>
    %cst_10 = arith.constant 0.000000e+00 : f32
    %43 = vector.broadcast %cst_10 : f32 to vector<3x1000xf32>
    %44 = arith.maximumf %42, %43 : vector<3x1000xf32>
    %45 = vector.broadcast %cst_10 : f32 to vector<3x1000xf32>
    %46 = arith.subf %42, %45 : vector<3x1000xf32>
    %47 = arith.cmpf one, %46, %46 : vector<3x1000xf32>
    %48 = vector.broadcast %cst_10 : f32 to vector<3x1000xf32>
    %49 = arith.addf %42, %48 : vector<3x1000xf32>
    %50 = math.absf %46 : vector<3x1000xf32>
    %cst_11 = arith.constant 0.000000e+00 : f32
    %51 = vector.broadcast %cst_11 : f32 to vector<3x1000xf32>
    %52 = arith.subf %51, %50 : vector<3x1000xf32>
    %53 = math.exp %52 : vector<3x1000xf32>
    %54 = math.log1p %53 : vector<3x1000xf32>
    %55 = arith.addf %44, %54 : vector<3x1000xf32>
    %56 = arith.select %47, %49, %55 : vector<3x1000xi1>, vector<3x1000xf32>
    %cst_12 = arith.constant 0.00999999977 : f32
    %57 = vector.broadcast %cst_12 : f32 to vector<3x1000xf32>
    %58 = arith.mulf %57, %56 : vector<3x1000xf32>
    %c4 = arith.constant 4 : index
    %c0_13 = arith.constant 0 : index
    %59 = vector.load %arg4[%c4, %c0_13] : memref<14x1000xf32, #tpu.memory_space<vmem>>, vector<3x1000xf32>
    tpu.vector_store %arg4[%c4, %c0_13], %58 {strides = array<i32>} : memref<14x1000xf32, #tpu.memory_space<vmem>>, vector<3x1000xf32>,
    %cst_14 = arith.constant 0.000000e+00 : f32
    %60 = vector.broadcast %cst_14 : f32 to vector<4x1000xf32>
    %c7 = arith.constant 7 : index
    %c0_15 = arith.constant 0 : index
    %61 = vector.load %arg4[%c7, %c0_15] : memref<14x1000xf32, #tpu.memory_space<vmem>>, vector<4x1000xf32>
    tpu.vector_store %arg4[%c7, %c0_15], %60 {strides = array<i32>} : memref<14x1000xf32, #tpu.memory_space<vmem>>, vector<4x1000xf32>,
    %62 = vector.extract_strided_slice %29 {offsets = [4, 0], sizes = [3, 1000], strides = [1, 1]} : vector<7x1000xf32> to vector<3x1000xf32>
    %63 = arith.negf %62 : vector<3x1000xf32>
    %64 = math.exp %63 : vector<3x1000xf32>
    %cst_16 = arith.constant 1.000000e+00 : f32
    %65 = vector.broadcast %cst_16 : f32 to vector<3x1000xf32>
    %66 = arith.addf %65, %64 : vector<3x1000xf32>
    %67 = arith.divf %65, %66 : vector<3x1000xf32>
    %c11 = arith.constant 11 : index
    %c0_17 = arith.constant 0 : index
    %68 = vector.load %arg4[%c11, %c0_17] : memref<14x1000xf32, #tpu.memory_space<vmem>>, vector<3x1000xf32>
    tpu.vector_store %arg4[%c11, %c0_17], %67 {strides = array<i32>} : memref<14x1000xf32, #tpu.memory_space<vmem>>, vector<3x1000xf32>,
    return
  }
  func.func @transform_0(%arg0: i32) -> (i32, i32) {
    %c0_i32 = arith.constant 0 : i32
    %c0_i32_0 = arith.constant 0 : i32
    return %c0_i32, %arg0 : i32, i32
  }
  func.func @transform_1(%arg0: i32) -> (i32, i32) {
    %c0_i32 = arith.constant 0 : i32
    %c0_i32_0 = arith.constant 0 : i32
    %c0_i32_1 = arith.constant 0 : i32
    return %c0_i32, %c0_i32_0 : i32, i32
  }
  func.func @transform_2(%arg0: i32) -> (i32, i32) {
    %c0_i32 = arith.constant 0 : i32
    %c0_i32_0 = arith.constant 0 : i32
    %c0_i32_1 = arith.constant 0 : i32
    return %c0_i32, %c0_i32_0 : i32, i32
  }
  func.func @transform_3(%arg0: i32) -> (i32, i32) {
    %c0_i32 = arith.constant 0 : i32
    %c0_i32_0 = arith.constant 0 : i32
    return %c0_i32, %arg0 : i32, i32
  }
}

</mosaic_0001>

<bundles_post_ra>
// kernel: tpu_custom_call.1
= control target key start
LH: loop header
LB: loop body
LE: loop exit
PB: predicated region body
PF: predicated region fallthrough
CT: control target
= control target key end

     0   :  { %8 = vsyncpa [#allocation3], 0  ;;  %s1138_s0 = inlined_call_operand.hbm [shape: f32[7,1000], index: 0, kind: input, shape index: {}]   ;;  %s1139_s1 = inlined_call_operand.vmem [shape: f32[7,4], index: 1, kind: input, shape index: {}]   ;;  %s1140_s2 = inlined_call_operand.vmem [shape: f32[7,1], index: 2, kind: input, shape index: {}]   ;;  %s1141_s3 = inlined_call_operand.hbm [shape: f32[14,1000], index: 3, kind: output, shape index: {}]  }
   0x1   :  { %9 = vsyncpa [#allocation4], 0  ;;  %s801_s12 = smov [#allocation2]   ;;  %s753_s16 = scalar_lea.hbm %s1138_s0, 1024 }
   0x2   :  { %s16_s13 = sshll.u32 %s801_s12, 4  ;;  %p754_p0 = scmp.ne.s32.totalorder %s1138_s0, %s753_s16  ;;  %s17_s13 = int_to_ptr.vmem [resolvable:$true] %s16_s13 }
   0x3   :  { %p757_p1 = scmp.lt.u32.totalorder %s753_s16, %s1138_s0 }
   0x5   :  { %p759_p2 = pnand %p757_p1, %p754_p0 }
   0x7   :  { %762 = shalt.err (!%p759_p2)
}
   0x8   :  { %s763_s21 = scalar_lea.vmem %s17_s13, 1024  ;;  %p768_p4 = scmp.lt.s32.totalorder %s17_s13, %s17_s13 }
   0x9   :  { %p764_p3 = scmp.ne.s32.totalorder %s17_s13, %s763_s21  ;;  %p769_p5 = scmp.lt.s32.totalorder %s763_s21, %s763_s21 }
   0xb   :  { %p770_p6 = por %p769_p5, %p768_p4 }
   0xd   :  { %p771_p7 = pnand %p770_p6, %p764_p3 }
   0xf   :  { %774 = shalt.err (!%p771_p7)
}
  0x10   :  { %19 = dma.hbm_to_vmem [thread:$0]  %s1138_s0, 1024, %s17_s13, [#allocation3]  }
  0x11   :  { %797 = dma.done.wait [#allocation3], 1024  }
  0x12   :  { %798 = vsyncadd [#allocation3], 4294966272  ;;  %v802_v0 = vmov 0   ;;  %v803_v1 = vmov 2   ;;  %v35_v2 = vld [vmem:[%s1139_s1] sm:$0x7f]  ;;  %v42_v31 = vlaneseq }
  0x13   :  { %683 = vset.pattern.permute.xlu0 %v802_v0  ;;  %685 = vset.pattern.permute.xlu1 %v803_v1  ;;  %vm298_vm0 = vcmask 845824   ;;  %vm605_vm1 = vcmask 850951   ;;  %v804_v3 = vmov 0.0   ;;  %v848_v4 = vld [vmem:[#allocation2] sm:$0x7f]  ;;  %v805_v12 = vmov 1  }
  0x14   :  { %39 = vperm.xlu0 %683, %v35_v2   ;;  %135 = vperm.xlu1 %685, %v35_v2   ;;  %598 = vst [vmem:[#allocation5] sm:$0x80] %v804_v3  ;;  %599 = vst [vmem:[#allocation5 + $0x8] sm:$0x80] %v804_v3  ;;  %v850_v5 = vld [vmem:[#allocation2 + $0x8] sm:$0x7f] }
  0x15   :  { %600 = vst [vmem:[#allocation5 + $0x10] sm:$0x80] %v804_v3  ;;  %601 = vst [vmem:[#allocation5 + $0x18] sm:$0x80] %v804_v3  ;;  %v852_v6 = vld [vmem:[#allocation2 + $0x10] sm:$0x7f] }
  0x16   :  { %602 = vst [vmem:[#allocation5 + $0x20] sm:$0x80] %v804_v3  ;;  %603 = vst [vmem:[#allocation5 + $0x28] sm:$0x80] %v804_v3  ;;  %v854_v7 = vld [vmem:[#allocation2 + $0x18] sm:$0x7f] }
  0x17   :  { %604 = vst [vmem:[#allocation5 + $0x30] sm:$0x80] %v804_v3  ;;  %606 = vst.msk [vmem:[#allocation5 + $0x38] sm:$0x80] %vm605_vm1, %v804_v3  ;;  %v856_v8 = vld [vmem:[#allocation2 + $0x20] sm:$0x7f] }
  0x18   :  { %607 = vst [vmem:[#allocation5 + $0x40] sm:$0x7] %v804_v3  ;;  %608 = vst [vmem:[#allocation5 + $0x48] sm:$0x7] %v804_v3  ;;  %v858_v9 = vld [vmem:[#allocation2 + $0x28] sm:$0x7f]  ;;  %684 = vset.pattern.permute.xlu0 %v805_v12 }
  0x19   :  { %609 = vst [vmem:[#allocation5 + $0x50] sm:$0x7] %v804_v3  ;;  %610 = vst [vmem:[#allocation5 + $0x58] sm:$0x7] %v804_v3  ;;  %v860_v10 = vld [vmem:[#allocation2 + $0x30] sm:$0x7f]  ;;  %83 = vperm.xlu0 %684, %v35_v2  }
  0x1a   :  { %611 = vst [vmem:[#allocation5 + $0x60] sm:$0x7] %v804_v3  ;;  %612 = vst [vmem:[#allocation5 + $0x68] sm:$0x7] %v804_v3  ;;  %v657_v11 = vclamps-f32 %v848_v4, 1.0  ;;  %v806_v13 = vmov 3  }
  0x1b   :  { %613 = vst [vmem:[#allocation5 + $0x70] sm:$0x7] %v804_v3  ;;  %614 = vst.msk [vmem:[#allocation5 + $0x78] sm:$0x7] %vm298_vm0, %v804_v3  ;;  %686 = vset.pattern.permute.xlu1 %v806_v13  ;;  %v863_v14 = vld [vmem:[#allocation2 + $0x38] sm:$0x7f] }
  0x1c   :  { %v658_v15 = vclamps-f32 %v850_v5, 1.0  ;;  %v659_v16 = vclamps-f32 %v852_v6, 1.0  ;;  %v660_v17 = vclamps-f32 %v854_v7, 1.0  ;;  %v661_v18 = vclamps-f32 %v856_v8, 1.0  ;;  %187 = vperm.xlu1 %686, %v35_v2   ;;  %v36_v27 = vld [vmem:[%s1140_s2] sm:$0x7f] }
  0x1d   :  { %v662_v19 = vclamps-f32 %v858_v9, 1.0  ;;  %v663_v20 = vclamps-f32 %v860_v10, 1.0  ;;  %v664_v21 = vclamps-f32 %v863_v14, 1.0  ;;  %v275_v22 = vrot.slane %v657_v11, 4  ;;  %688 = vset.pattern.permute.xlu0 %v802_v0  ;;  %s808_s2 = smov [#allocation5]  }
  0x1e   :  { %v276_v23 = vrot.slane %v658_v15, 4  ;;  %v277_v24 = vrot.slane %v659_v16, 4  ;;  %v278_v25 = vrot.slane %v660_v17, 4  ;;  %v279_v26 = vrot.slane %v661_v18, 4  ;;  %s645_s26 = sshll.u32 %s808_s2, 4  ;;  %s646_s26 = int_to_ptr.vmem [resolvable:$true] %s645_s26 }
  0x1f   :  { %v280_v28 = vrot.slane %v662_v19, 4  ;;  %v281_v29 = vrot.slane %v663_v20, 4  ;;  %v282_v30 = vrot.slane %v664_v21, 4  ;;  %291 = vst [vmem:[#allocation5] sm:$0x7] %v275_v22  ;;  %v879_v32 = vshrl.u32 %v42_v31, 7  ;;  %p780_p9 = scmp.lt.s32.totalorder %s646_s26, %s646_s26 }
  0x20   :  { %292 = vst [vmem:[#allocation5 + $0x8] sm:$0x7] %v276_v23  ;;  %293 = vst [vmem:[#allocation5 + $0x10] sm:$0x7] %v277_v24  ;;  %687 = vset.pattern.permute.xlu1 %v802_v0  ;;  %vm968_vm2 = vcmp.lt.s32.totalorder %v42_v31, 1000  ;;  %vm638_vm3 = vcmask 848899  }
  0x21   :  { %294 = vst [vmem:[#allocation5 + $0x18] sm:$0x7] %v278_v25  ;;  %295 = vst [vmem:[#allocation5 + $0x20] sm:$0x7] %v279_v26  ;;  %240 = vperm.xlu1 %687, %v36_v27   ;;  %v140_v33 = vsub.s32 2, %v879_v32  ;;  %v44_v34 = vsub.s32 0, %v879_v32 }
  0x22   :  { %296 = vst [vmem:[#allocation5 + $0x28] sm:$0x7] %v280_v28  ;;  %297 = vst [vmem:[#allocation5 + $0x30] sm:$0x7] %v281_v29  ;;  %v88_v38 = vsub.s32 1, %v879_v32  ;;  %v897_v48 = vsub.s32 3, %v879_v32 }
  0x23   :  { %299 = vst.msk [vmem:[#allocation5 + $0x38] sm:$0x7] %vm298_vm0, %v282_v30  ;;  %v141_v35 = vrot.slane %v848_v4, %v140_v33  ;;  %v145_v36 = vrot.slane %v850_v5, %v140_v33  ;;  %v149_v37 = vrot.slane %v852_v6, %v140_v33  ;;  %v45_v39 = vrot.slane %v848_v4, %v44_v34  ;;  %s775_s27 = scalar_lea.vmem %s646_s26, 2048 }
  0x24   :  { %v49_v40 = vrot.slane %v850_v5, %v44_v34  ;;  %v153_v41 = vrot.slane %v854_v7, %v140_v33  ;;  %v157_v42 = vrot.slane %v856_v8, %v140_v33  ;;  %v161_v43 = vrot.slane %v858_v9, %v140_v33  ;;  %p776_p8 = scmp.ne.s32.totalorder %s646_s26, %s775_s27  ;;  %p781_p10 = scmp.lt.s32.totalorder %s775_s27, %s775_s27 }
  0x25   :  { %v53_v44 = vrot.slane %v852_v6, %v44_v34  ;;  %v165_v45 = vrot.slane %v860_v10, %v140_v33  ;;  %v169_v46 = vrot.slane %v863_v14, %v140_v33  ;;  %v57_v47 = vrot.slane %v854_v7, %v44_v34 }
  0x26   :  { %v61_v49 = vrot.slane %v856_v8, %v44_v34  ;;  %v65_v50 = vrot.slane %v858_v9, %v44_v34  ;;  %v69_v51 = vrot.slane %v860_v10, %v44_v34  ;;  %v73_v52 = vrot.slane %v863_v14, %v44_v34  ;;  %p782_p11 = por %p781_p10, %p780_p9 }
  0x27   :  { %v89_v53 = vrot.slane %v848_v4, %v88_v38  ;;  %v93_v54 = vrot.slane %v850_v5, %v88_v38  ;;  %v97_v55 = vrot.slane %v852_v6, %v88_v38  ;;  %v101_v56 = vrot.slane %v854_v7, %v88_v38 }
  0x28   :  { %v105_v57 = vrot.slane %v856_v8, %v88_v38  ;;  %v109_v58 = vrot.slane %v858_v9, %v88_v38  ;;  %v113_v59 = vrot.slane %v860_v10, %v88_v38  ;;  %v117_v60 = vrot.slane %v863_v14, %v88_v38  ;;  %p783_p12 = pnand %p782_p11, %p776_p8 }
  0x29   :  { %v193_v63 = vrot.slane %v848_v4, %v897_v48  ;;  %v197_v0 = vrot.slane %v850_v5, %v897_v48  ;;  %v201_v1 = vrot.slane %v852_v6, %v897_v48  ;;  %v205_v2 = vrot.slane %v854_v7, %v897_v48 }
  0x2a   :  { %v209_v3 = vrot.slane %v856_v8, %v897_v48  ;;  %v213_v11 = vrot.slane %v858_v9, %v897_v48  ;;  %v217_v12 = vrot.slane %v860_v10, %v897_v48  ;;  %v221_v4 = vrot.slane %v863_v14, %v897_v48 }
  0x93   :  { %v40_v61 = vpop.permute.xlu0 %39  ;;  %v136_v62 = vpop.permute.xlu1 %135 }
  0x94   :  { %v170_v13 = vmul.f32 %v141_v35, %v136_v62  ;;  %v171_v5 = vmul.f32 %v145_v36, %v136_v62  ;;  %v172_v15 = vmul.f32 %v149_v37, %v136_v62  ;;  %v173_v16 = vmul.f32 %v153_v41, %v136_v62 }
  0x95   :  { %v174_v6 = vmul.f32 %v157_v42, %v136_v62  ;;  %v175_v17 = vmul.f32 %v161_v43, %v136_v62  ;;  %v176_v18 = vmul.f32 %v165_v45, %v136_v62  ;;  %v177_v7 = vmul.f32 %v169_v46, %v136_v62 }
  0x96   :  { %v74_v19 = vmul.f32 %v45_v39, %v40_v61  ;;  %v75_v20 = vmul.f32 %v49_v40, %v40_v61  ;;  %v76_v8 = vmul.f32 %v53_v44, %v40_v61  ;;  %v77_v21 = vmul.f32 %v57_v47, %v40_v61 }
  0x97   :  { %v78_v9 = vmul.f32 %v61_v49, %v40_v61  ;;  %v79_v23 = vmul.f32 %v65_v50, %v40_v61  ;;  %v80_v24 = vmul.f32 %v69_v51, %v40_v61  ;;  %v81_v10 = vmul.f32 %v73_v52, %v40_v61 }
  0x98   :  { %v84_v22 = vpop.permute.xlu0 %83 }
  0x99   :  { %v118_v25 = vmul.f32 %v89_v53, %v84_v22  ;;  %v119_v26 = vmul.f32 %v93_v54, %v84_v22  ;;  %v120_v14 = vmul.f32 %v97_v55, %v84_v22  ;;  %v121_v27 = vmul.f32 %v101_v56, %v84_v22 }
  0x9a   :  { %v122_v28 = vmul.f32 %v105_v57, %v84_v22  ;;  %v123_v29 = vmul.f32 %v109_v58, %v84_v22  ;;  %v124_v30 = vmul.f32 %v113_v59, %v84_v22  ;;  %v125_v33 = vmul.f32 %v117_v60, %v84_v22 }
  0x9b   :  { %v188_v34 = vpop.permute.xlu1 %187  ;;  %v126_v35 = vadd.f32 %v118_v25, %v74_v19  ;;  %v127_v36 = vadd.f32 %v119_v26, %v75_v20  ;;  %v128_v37 = vadd.f32 %v120_v14, %v76_v8  ;;  %v129_v38 = vadd.f32 %v121_v27, %v77_v21 }
  0x9c   :  { %v130_v39 = vadd.f32 %v122_v28, %v78_v9  ;;  %v131_v40 = vadd.f32 %v123_v29, %v79_v23  ;;  %v132_v41 = vadd.f32 %v124_v30, %v80_v24  ;;  %v133_v42 = vadd.f32 %v125_v33, %v81_v10 }
  0x9d   :  { %v178_v43 = vadd.f32 %v170_v13, %v126_v35  ;;  %v179_v44 = vadd.f32 %v171_v5, %v127_v36  ;;  %v180_v45 = vadd.f32 %v172_v15, %v128_v37  ;;  %v181_v46 = vadd.f32 %v173_v16, %v129_v38 }
  0x9e   :  { %v182_v47 = vadd.f32 %v174_v6, %v130_v39  ;;  %v183_v48 = vadd.f32 %v175_v17, %v131_v40  ;;  %v184_v49 = vadd.f32 %v176_v18, %v132_v41  ;;  %v185_v50 = vadd.f32 %v177_v7, %v133_v42 }
  0x9f   :  { %v222_v51 = vmul.f32 %v193_v63, %v188_v34  ;;  %v223_v52 = vmul.f32 %v197_v0, %v188_v34  ;;  %v224_v53 = vmul.f32 %v201_v1, %v188_v34  ;;  %v225_v54 = vmul.f32 %v205_v2, %v188_v34 }
  0xa0   :  { %v241_v55 = vpop.permute.xlu1 %240  ;;  %v226_v56 = vmul.f32 %v209_v3, %v188_v34  ;;  %v227_v57 = vmul.f32 %v213_v11, %v188_v34  ;;  %v228_v58 = vmul.f32 %v217_v12, %v188_v34  ;;  %v229_v59 = vmul.f32 %v221_v4, %v188_v34 }
  0xa1   :  { %v230_v60 = vadd.f32 %v222_v51, %v178_v43  ;;  %v231_v61 = vadd.f32 %v223_v52, %v179_v44  ;;  %v232_v62 = vadd.f32 %v224_v53, %v180_v45  ;;  %v233_v13 = vadd.f32 %v225_v54, %v181_v46 }
  0xa2   :  { %v234_v5 = vadd.f32 %v226_v56, %v182_v47  ;;  %v235_v15 = vadd.f32 %v227_v57, %v183_v48  ;;  %v236_v16 = vadd.f32 %v228_v58, %v184_v49  ;;  %v237_v6 = vadd.f32 %v229_v59, %v185_v50 }
  0xa3   :  { %v927_v17 = vadd.f32 %v241_v55, %v230_v60  ;;  %v929_v18 = vadd.f32 %v241_v55, %v231_v61  ;;  %v931_v63 = vadd.f32 %v241_v55, %v232_v62  ;;  %v933_v0 = vadd.f32 %v241_v55, %v233_v13 }
  0xa4   :  { %v935_v1 = vadd.f32 %v241_v55, %v234_v5  ;;  %v937_v2 = vadd.f32 %v241_v55, %v235_v15  ;;  %v939_v3 = vadd.f32 %v241_v55, %v236_v16  ;;  %v944_v7 = vadd.f32 %v241_v55, %v237_v6 }
  0xa5   :  { %v665_v11 = vmul.f32 -1.442695, %v927_v17  ;;  %v666_v12 = vmul.f32 -1.442695, %v929_v18  ;;  %v667_v4 = vmul.f32 -1.442695, %v931_v63  ;;  %vm421_vm4 = vcmp.ne.f32.partialorder %v927_v17, %v927_v17 }
  0xa6   :  { %v668_v19 = vmul.f32 -1.442695, %v933_v0  ;;  %v669_v20 = vmul.f32 -1.442695, %v935_v1  ;;  %v670_v8 = vmul.f32 -1.442695, %v937_v2  ;;  %vm422_vm5 = vcmp.ne.f32.partialorder %v929_v18, %v929_v18 }
  0xa7   :  { %689 = vpow2.f32 %v665_v11  ;;  %v671_v21 = vmul.f32 -1.442695, %v939_v3  ;;  %v672_v22 = vmul.f32 -1.442695, %v944_v7  ;;  %v437_v9 = vand.u32 2147483647, %v927_v17 }
  0xa8   :  { %691 = vpow2.f32 %v666_v12  ;;  %v438_v24 = vand.u32 2147483647, %v929_v18  ;;  %v439_v25 = vand.u32 2147483647, %v931_v63  ;;  %v440_v28 = vand.u32 2147483647, %v933_v0 }
  0xa9   :  { %693 = vpow2.f32 %v667_v4  ;;  %v445_v23 = vsub.f32 0.0, %v437_v9  ;;  %v441_v33 = vand.u32 2147483647, %v935_v1  ;;  %v807_v35 = vmov 1966171168  }
  0xaa   :  { %695 = vpow2.f32 %v668_v19  ;;  %v361_v36 = vunpack.c.l.s4 %v807_v35  ;;  %v446_v38 = vsub.f32 0.0, %v438_v24  ;;  %v442_v41 = vand.u32 2147483647, %v937_v2 }
  0xab   :  { %697 = vpow2.f32 %v669_v20  ;;  %v453_v26 = vmul.f32 1.442695, %v445_v23  ;;  %v447_v42 = vsub.f32 0.0, %v439_v25  ;;  %v443_v45 = vand.u32 2147483647, %v939_v3 }
  0xac   :  { %699 = vpow2.f32 %v670_v8  ;;  %v448_v46 = vsub.f32 0.0, %v440_v28  ;;  %v449_v49 = vsub.f32 0.0, %v441_v33  ;;  %v444_v52 = vand.u32 2147483647, %v944_v7 }
  0xad   :  { %701 = vpow2.f32 %v671_v21  ;;  %v455_v53 = vmul.f32 1.442695, %v446_v38  ;;  %v450_v55 = vsub.f32 0.0, %v442_v41  ;;  %v457_v56 = vmul.f32 1.442695, %v447_v42 }
  0xae   :  { %703 = vpow2.f32 %v672_v22  ;;  %v362_v57 = vunpack.c.0.s8 %v361_v36  ;;  %v451_v58 = vsub.f32 0.0, %v443_v45  ;;  %v459_v59 = vmul.f32 1.442695, %v448_v46 }
  0xaf   :  { %705 = vpow2.f32 %v453_v26  ;;  %v461_v60 = vmul.f32 1.442695, %v449_v49  ;;  %v452_v62 = vsub.f32 0.0, %v444_v52  ;;  %v463_v13 = vmul.f32 1.442695, %v450_v55 }
  0xb0   :  { %v962_v15 = vsub.s32 %v362_v57, %v879_v32  ;;  %v465_v16 = vmul.f32 1.442695, %v451_v58  ;;  %v413_v31 = vmax.f32 %v927_v17, 0.0  ;;  %v415_v45 = vmax.f32 %v931_v63, 0.0 }
  0xb1   :  { %v690_v10 = vpop.eup %689  ;;  %v467_v8 = vmul.f32 1.442695, %v452_v62  ;;  %v416_v46 = vmax.f32 %v933_v0, 0.0  ;;  %v417_v49 = vmax.f32 %v935_v1, 0.0  ;;  %vm423_vm8 = vcmp.ne.f32.partialorder %v931_v63, %v931_v63 }
  0xb2   :  { %v692_v14 = vpop.eup %691  ;;  %v324_v27 = vadd.f32 1.0, %v690_v10  ;;  %vm424_vm10 = vcmp.ne.f32.partialorder %v933_v0, %v933_v0  ;;  %vm425_vm12 = vcmp.ne.f32.partialorder %v935_v1, %v935_v1  ;;  %vm426_vm14 = vcmp.ne.f32.partialorder %v937_v2, %v937_v2 }
  0xb3   :  { %v694_v29 = vpop.eup %693  ;;  %v325_v30 = vadd.f32 1.0, %v692_v14 }
  0xb4   :  { %v696_v34 = vpop.eup %695  ;;  %v326_v37 = vadd.f32 1.0, %v694_v29  ;;  %707 = vrcp.f32 %v324_v27 }
  0xb5   :  { %v698_v39 = vpop.eup %697  ;;  %v327_v40 = vadd.f32 1.0, %v696_v34  ;;  %709 = vrcp.f32 %v325_v30 }
  0xb6   :  { %v700_v43 = vpop.eup %699  ;;  %v328_v44 = vadd.f32 1.0, %v698_v39  ;;  %711 = vrcp.f32 %v326_v37 }
  0xb7   :  { %v702_v47 = vpop.eup %701  ;;  %v329_v48 = vadd.f32 1.0, %v700_v43  ;;  %713 = vrcp.f32 %v327_v40  ;;  %v414_v40 = vmax.f32 %v929_v18, 0.0 }
  0xb8   :  { %v704_v50 = vpop.eup %703  ;;  %v330_v51 = vadd.f32 1.0, %v702_v47  ;;  %715 = vrcp.f32 %v328_v44 }
  0xb9   :  { %v331_v54 = vadd.f32 1.0, %v704_v50  ;;  %717 = vrcp.f32 %v329_v48  ;;  %v959_v61 = vpop.eup %705  ;;  %v418_v50 = vmax.f32 %v937_v2, 0.0 }
  0xba   :  { %719 = vrcp.f32 %v330_v51  ;;  %v469_v11 = vadd.f32 1.0, %v959_v61  ;;  %v472_v41 = vmul.f32 -0.5, %v959_v61  ;;  %v475_v58 = vand.u32 2147483647, %v959_v61 }
  0xbb   :  { %721 = vrcp.f32 %v331_v54 }
  0xbc   :  { %723 = vpow2.f32 %v455_v53  ;;  %v473_v57 = vadd.f32 1.0, %v472_v41  ;;  %vm1022_vm6 = vcmp.lt.f32.partialorder %v475_v58, 0.0004427343 }
  0xbd   :  { %725 = vpow2.f32 %v457_v56  ;;  %v419_v56 = vmax.f32 %v939_v3, 0.0 }
  0xbe   :  { %v708_v5 = vpop.eup %707  ;;  %727 = vpow2.f32 %v459_v59 }
  0xbf   :  { %v710_v6 = vpop.eup %709  ;;  %729 = vpow2.f32 %v461_v60  ;;  %v615_v12 = vrot.slane %v708_v5, 1 }
  0xc0   :  { %v712_v4 = vpop.eup %711  ;;  %v356_v19 = vcombine.low %v708_v5, %v710_v6  ;;  %731 = vpow2.f32 %v463_v13  ;;  %v616_v21 = vrot.slane %v710_v6, 1 }
  0xc1   :  { %v714_v20 = vpop.eup %713  ;;  %v617_v22 = vrot.slane %v712_v4, 1  ;;  %631 = vst [vmem:[#allocation5 + $0x40] sm:$0x38] %v615_v12  ;;  %733 = vpow2.f32 %v465_v16 }
  0xc2   :  { %v716_v9 = vpop.eup %715  ;;  %v357_v23 = vcombine.low %v712_v4, %v714_v20  ;;  %v366_v32 = vrot.slane %v356_v19, %v962_v15  ;;  %735 = vlog2.f32 %v469_v11  ;;  %v618_v10 = vrot.slane %v714_v20, 1  ;;  %632 = vst [vmem:[#allocation5 + $0x48] sm:$0x38] %v616_v21 }
  0xc3   :  { %v718_v24 = vpop.eup %717  ;;  %v619_v25 = vrot.slane %v716_v9, 1  ;;  %633 = vst [vmem:[#allocation5 + $0x50] sm:$0x38] %v617_v22  ;;  %737 = vpow2.f32 %v467_v8  ;;  %v474_v21 = vmul.f32 %v959_v61, %v473_v57 }
  0xc4   :  { %v720_v26 = vpop.eup %719  ;;  %v358_v14 = vcombine.low %v716_v9, %v718_v24  ;;  %v373_v27 = vrot.slane %v357_v23, %v962_v15  ;;  %v620_v28 = vrot.slane %v718_v24, 1  ;;  %634 = vst [vmem:[#allocation5 + $0x58] sm:$0x38] %v618_v10 }
  0xc5   :  { %v722_v29 = vpop.eup %721  ;;  %v621_v33 = vrot.slane %v720_v26, 1  ;;  %635 = vst [vmem:[#allocation5 + $0x60] sm:$0x38] %v619_v25 }
  0xc6   :  { %v972_v34 = vpop.eup %723  ;;  %v359_v35 = vcombine.low %v720_v26, %v722_v29  ;;  %v380_v36 = vrot.slane %v358_v14, %v962_v15  ;;  %v388_v37 = vcombine.low %v366_v32, %v373_v27  ;;  %v622_v38 = vrot.slane %v722_v29, 1  ;;  %636 = vst [vmem:[#allocation5 + $0x68] sm:$0x38] %v620_v28 }
  0xc7   :  { %v975_v39 = vpop.eup %725  ;;  %v478_v42 = vadd.f32 1.0, %v972_v34  ;;  %637 = vst [vmem:[#allocation5 + $0x70] sm:$0x38] %v621_v33  ;;  %v481_v51 = vmul.f32 -0.5, %v972_v34  ;;  %v484_v13 = vand.u32 2147483647, %v972_v34 }
  0xc8   :  { %v981_v43 = vpop.eup %727  ;;  %v387_v44 = vrot.slane %v359_v35, %v962_v15  ;;  %v487_v47 = vadd.f32 1.0, %v975_v39  ;;  %639 = vst.msk [vmem:[#allocation5 + $0x78] sm:$0x38] %vm638_vm3, %v622_v38  ;;  %v396_v53 = vrot.slane %v388_v37, %v962_v15  ;;  %v490_v59 = vmul.f32 -0.5, %v975_v39 }
  0xc9   :  { %v988_v48 = vpop.eup %729  ;;  %739 = vlog2.f32 %v478_v42  ;;  %v496_v54 = vadd.f32 1.0, %v981_v43  ;;  %v482_v6 = vadd.f32 1.0, %v481_v51  ;;  %v493_v11 = vand.u32 2147483647, %v975_v39 }
  0xca   :  { %v389_v52 = vcombine.low %v380_v36, %v387_v44  ;;  %741 = vlog2.f32 %v487_v47  ;;  %v995_v55 = vpop.eup %731  ;;  %v505_v5 = vadd.f32 1.0, %v988_v48  ;;  %v499_v12 = vmul.f32 -0.5, %v981_v43 }
  0xcb   :  { %v1000_v60 = vpop.eup %733  ;;  %743 = vlog2.f32 %v496_v54  ;;  %v508_v4 = vmul.f32 -0.5, %v988_v48  ;;  %v491_v22 = vadd.f32 1.0, %v490_v59  ;;  %v502_v9 = vand.u32 2147483647, %v981_v43 }
  0xcc   :  { %v403_v62 = vrot.slane %v389_v52, %v962_v15  ;;  %v736_v16 = vpop.eup %735  ;;  %745 = vlog2.f32 %v505_v5  ;;  %v514_v15 = vadd.f32 1.0, %v995_v55  ;;  %v517_v23 = vmul.f32 -0.5, %v995_v55 }
  0xcd   :  { %v471_v20 = vmul.f32 0.6931472, %v736_v16  ;;  %v1011_v8 = vpop.eup %737  ;;  %vm1026_vm7 = vcmp.lt.f32.partialorder %v484_v13, 0.0004427343  ;;  %v523_v24 = vadd.f32 1.0, %v1000_v60  ;;  %v500_v25 = vadd.f32 1.0, %v499_v12 }
  0xce   :  { %v404_v19 = vcombine.low %v396_v53, %v403_v62  ;;  %747 = vlog2.f32 %v514_v15  ;;  %v509_v26 = vadd.f32 1.0, %v508_v4  ;;  %v511_v14 = vand.u32 2147483647, %v988_v48 }
  0xcf   :  { %v477_v10 = vsel %vm1022_vm6, %v474_v21, %v471_v20  ;;  %v483_v27 = vmul.f32 %v972_v34, %v482_v6  ;;  %vm1037_vm9 = vcmp.lt.f32.partialorder %v493_v11, 0.0004427343  ;;  %749 = vlog2.f32 %v523_v24 }
  0xd0   :  { %411 = vst.msk [vmem:[#allocation5 + $0x3] ss:$8 sm:$0xf] %vm968_vm2, %v404_v19  ;;  %412 = vst.msk [vmem:[#allocation5 + $0x3] ss:$8 sm:$0xf0] %vm968_vm2, %v404_v19  ;;  %v492_v33 = vmul.f32 %v975_v39, %v491_v22  ;;  %v541_v42 = vadd.f32 %v477_v10, %v413_v31  ;;  %v501_v39 = vmul.f32 %v981_v43, %v500_v25 }
  0xd1   :  { %v532_v29 = vadd.f32 1.0, %v1011_v8  ;;  %vm1045_vm11 = vcmp.lt.f32.partialorder %v502_v9, 0.0004427343  ;;  %v518_v36 = vadd.f32 1.0, %v517_v23  ;;  %v520_v34 = vand.u32 2147483647, %v995_v55 }
  0xd2   :  { %v526_v41 = vmul.f32 -0.5, %v1000_v60  ;;  %v510_v47 = vmul.f32 %v988_v48, %v509_v26  ;;  %vm1057_vm13 = vcmp.lt.f32.partialorder %v511_v14, 0.0004427343  ;;  %v529_v54 = vand.u32 2147483647, %v1000_v60 }
  0xd3   :  { %v740_v30 = vpop.eup %739  ;;  %751 = vlog2.f32 %v532_v29  ;;  %v535_v31 = vmul.f32 -0.5, %v1011_v8  ;;  %v549_v57 = vsel %vm421_vm4, %v927_v17, %v541_v42  ;;  %v519_v13 = vmul.f32 %v995_v55, %v518_v36 }
  0xd4   :  { %v742_v37 = vpop.eup %741  ;;  %v480_v38 = vmul.f32 0.6931472, %v740_v30  ;;  %v557_v59 = vmul.f32 0.01, %v549_v57  ;;  %vm1076_vm15 = vcmp.lt.f32.partialorder %v520_v34, 0.0004427343  ;;  %vm427_vm2 = vcmp.ne.f32.partialorder %v939_v3, %v939_v3 }
  0xd5   :  { %v489_v44 = vmul.f32 0.6931472, %v742_v37  ;;  %v744_v52 = vpop.eup %743  ;;  %v527_v16 = vadd.f32 1.0, %v526_v41  ;;  %v536_v55 = vadd.f32 1.0, %v535_v31  ;;  %v538_v22 = vand.u32 2147483647, %v1011_v8 }
  0xd6   :  { %v486_v53 = vsel %vm1026_vm7, %v483_v27, %v480_v38  ;;  %v498_v48 = vmul.f32 0.6931472, %v744_v52  ;;  %v746_v62 = vpop.eup %745  ;;  %v573_v12 = vrot.slane %v557_v59, 5  ;;  %vm530_vm0 = vcmp.lt.f32.partialorder %v529_v54, 0.0004427343 }
  0xd7   :  { %v495_v43 = vsel %vm1037_vm9, %v492_v33, %v489_v44  ;;  %v542_v58 = vadd.f32 %v486_v53, %v414_v40  ;;  %v507_v11 = vmul.f32 0.6931472, %v746_v62  ;;  %v528_v23 = vmul.f32 %v1000_v60, %v527_v16 }
  0xd8   :  { %v543_v17 = vadd.f32 %v495_v43, %v415_v45  ;;  %v504_v6 = vsel %vm1045_vm11, %v501_v39, %v498_v48  ;;  %v748_v4 = vpop.eup %747  ;;  %589 = vst [vmem:[#allocation5] sm:$0x70] %v573_v12  ;;  %v537_v14 = vmul.f32 %v1011_v8, %v536_v55  ;;  %v420_v30 = vmax.f32 %v944_v7, 0.0 }
  0xd9   :  { %v550_v40 = vsel %vm422_vm5, %v929_v18, %v542_v58  ;;  %v544_v19 = vadd.f32 %v504_v6, %v416_v46  ;;  %v513_v15 = vsel %vm1057_vm13, %v510_v47, %v507_v11  ;;  %v516_v21 = vmul.f32 0.6931472, %v748_v4  ;;  %v750_v18 = vpop.eup %749 }
  0xda   :  { %v551_v45 = vsel %vm423_vm8, %v931_v63, %v543_v17  ;;  %v558_v20 = vmul.f32 0.01, %v550_v40  ;;  %v545_v46 = vadd.f32 %v513_v15, %v417_v49  ;;  %v525_v24 = vmul.f32 0.6931472, %v750_v18 }
  0xdb   :  { %v559_v9 = vmul.f32 0.01, %v551_v45  ;;  %v552_v63 = vsel %vm424_vm10, %v933_v0, %v544_v19  ;;  %v522_v61 = vsel %vm1076_vm15, %v519_v13, %v516_v21  ;;  %vm539_vm1 = vcmp.lt.f32.partialorder %v538_v22, 0.0004427343 }
  0xdc   :  { %v574_v32 = vrot.slane %v558_v20, 5  ;;  %v560_v10 = vmul.f32 0.01, %v552_v63  ;;  %v546_v60 = vadd.f32 %v522_v61, %v418_v50  ;;  %v553_v49 = vsel %vm425_vm12, %v935_v1, %v545_v46 }
  0xdd   :  { %v575_v25 = vrot.slane %v559_v9, 5  ;;  %v752_v26 = vpop.eup %751  ;;  %v531_v0 = vsel %vm530_vm0, %v528_v23, %v525_v24  ;;  %v561_v28 = vmul.f32 0.01, %v553_v49  ;;  %vm428_vm3 = vcmp.ne.f32.partialorder %v944_v7, %v944_v7 }
  0xde   :  { %590 = vst [vmem:[#allocation5 + $0x8] sm:$0x70] %v574_v32  ;;  %v534_v27 = vmul.f32 0.6931472, %v752_v26  ;;  %v576_v29 = vrot.slane %v560_v10, 5  ;;  %v547_v8 = vadd.f32 %v531_v0, %v419_v56  ;;  %v554_v50 = vsel %vm426_vm14, %v937_v2, %v546_v60 }
  0xdf   :  { %591 = vst [vmem:[#allocation5 + $0x10] sm:$0x70] %v575_v25  ;;  %v562_v33 = vmul.f32 0.01, %v554_v50  ;;  %v577_v35 = vrot.slane %v561_v28, 5  ;;  %vm596_vm4 = vcmask 849924  }
  0xe0   :  { %v540_v1 = vsel %vm539_vm1, %v537_v14, %v534_v27  ;;  %592 = vst [vmem:[#allocation5 + $0x18] sm:$0x70] %v576_v29  ;;  %v555_v34 = vsel %vm427_vm2, %v939_v3, %v547_v8 }
  0xe1   :  { %v548_v36 = vadd.f32 %v540_v1, %v420_v30  ;;  %v563_v37 = vmul.f32 0.01, %v555_v34  ;;  %v578_v56 = vrot.slane %v562_v33, 5  ;;  %593 = vst [vmem:[#allocation5 + $0x20] sm:$0x70] %v577_v35 }
  0xe3   :  { %v556_v38 = vsel %vm428_vm3, %v944_v7, %v548_v36  ;;  %v579_v41 = vrot.slane %v563_v37, 5  ;;  %594 = vst [vmem:[#allocation5 + $0x28] sm:$0x70] %v578_v56 }
  0xe4   :  { %v564_v2 = vmul.f32 0.01, %v556_v38 }
  0xe5   :  { %595 = vst [vmem:[#allocation5 + $0x30] sm:$0x70] %v579_v41 }
  0xe6   :  { %v580_v42 = vrot.slane %v564_v2, 5 }
  0xe8   :  { %597 = vst.msk [vmem:[#allocation5 + $0x38] sm:$0x70] %vm596_vm4, %v580_v42 }
  0xe9   :  { %786 = shalt.err (!%p783_p12)
}
  0xea   :  { %s787_s30 = scalar_lea.hbm %s1141_s3, 2048 }
  0xeb   :  { %p788_p13 = scmp.ne.s32.totalorder %s1141_s3, %s787_s30  ;;  %p791_p0 = scmp.lt.u32.totalorder %s787_s30, %s1141_s3 }
  0xed   :  { %p793_p1 = pnand %p791_p0, %p788_p13 }
  0xef   :  { %796 = shalt.err (!%p793_p1)
}
  0xf0   :  { %s809_s8 = smov 1024   ;;  %s810_s9 = smov 64  }
  0xf1   :  { %651 = dma.vmem_to_hbm [thread:$0]  %s646_s26, 2048, %s1141_s3, [#allocation4], %s809_s8, %s809_s8, %s810_s9  }
  0xf2   :  { %799 = dma.done.wait [#allocation4], 2048  }
  0xf3   :  { %800 = vsyncadd [#allocation4], 4294965248 }
  0xf4   :  { %655 = vsyncpa [#allocation3], 1 }
  0xf5   :  { %656 = vsyncpa [#allocation4], 1 }

</bundles_post_ra>
